<compile_context>
chip_gen: v6e
topology: v6e:2x2x1
jax: 0.10.0
libtpu: 0.0.40
codegen_flags: <defaults>
</compile_context>

<pallas_src>
import jax
import jax.numpy as jnp
from jax import lax
from jax.experimental import pallas as pl
from jax.experimental.pallas import tpu as pltpu


def _round_up(x, m):
    return ((x + m - 1) // m) * m


def _vmem_budget_bytes():
    """Generation-aware VMEM budget for the kernel working set."""
    phys = 64 << 20                      # conservative default: v7x physical VMEM
    try:
        phys = int(pltpu.get_tpu_info().vmem_capacity_bytes)
    except Exception:                    # interpret mode / older runtimes
        pass
    # ~48 MiB on v7x (64 MiB phys), ~96 MiB on v5e/v6e (128 MiB phys).
    return min(phys * 3 // 4, phys - (16 << 20))


# ----------------------------------------------------------------------------
# Pallas kernels:  y = x @ W + b   (weight already in [K, N] layout)
# ----------------------------------------------------------------------------
def _linear_bias_kernel_acc(x_ref, w_ref, b_ref, o_ref, acc_ref):
    """K tiled over grid axis 2; f32 VMEM accumulator; bias add at finalize."""
    @pl.when(pl.program_id(2) == 0)
    def _():
        acc_ref[...] = jnp.zeros_like(acc_ref)

    # MXU-native [tm, tk] x [tk, tn]; no in-kernel transpose.
    acc_ref[...] += jnp.dot(x_ref[...], w_ref[...],
                            preferred_element_type=jnp.float32)

    @pl.when(pl.program_id(2) == pl.num_programs(2) - 1)
    def _():
        o_ref[...] = (acc_ref[...] + b_ref[...]).astype(o_ref.dtype)


def _linear_bias_kernel_1pass(x_ref, w_ref, b_ref, o_ref):
    """Whole K in a single tile: no accumulator round-trip through VMEM."""
    o_ref[...] = (jnp.dot(x_ref[...], w_ref[...],
                          preferred_element_type=jnp.float32)
                  + b_ref[...]).astype(o_ref.dtype)


def linear_pallas(x2d, w_kn, b):
    """y = x2d @ w_kn + b via an M/N/K-tiled Pallas TPU kernel.

    x2d: [M, K]   w_kn: [K, N] (pre-transposed, kernel-native)   b: [N]
    Returns [M, N] in x2d.dtype.  The matmul runs in w_kn.dtype (bf16 by
    default); accumulation and bias math stay f32.
    """
    out_dtype = x2d.dtype
    M, K = x2d.shape
    Kw, N = w_kn.shape
    assert K == Kw, (K, Kw)

    mat_dtype = w_kn.dtype
    isz = jnp.dtype(mat_dtype).itemsize
    osz = jnp.dtype(out_dtype).itemsize
    sub = 16 if isz == 2 else 8          # sublane granularity per dtype

    budget = _vmem_budget_bytes()

    # ---- tile selection ------------------------------------------------
    tm = min(512, _round_up(M, sub))
    m_steps = _round_up(M, tm) // tm

    n128 = _round_up(N, 128)
    tn = min(1024, n128)
    if m_steps == 1 and n128 >= 256:
        # Only one M tile (decode-sized M): split N so there are >=2 parallel
        # grid steps (keeps both v7x TensorCores / the pipeline busy).
        tn = min(tn, max(128, (n128 // 2) // 128 * 128))

    k128 = _round_up(K, 128)
    tk = k128                            # prefer a single full-K pass

    def _k_steps(tk_):
        return _round_up(K, tk_) // tk_

    def _need(tm_, tn_, tk_):
        acc = tm_ * tn_ * 4 if _k_steps(tk_) > 1 else 0
        return (2 * (tm_ * tk_ * isz + tk_ * tn_ * isz + tn_ * 4
                     + tm_ * tn_ * osz) + acc)

    # Shrink (tk first, then tn, then tm) until the double-buffered working
    # set fits the generation-aware VMEM budget.
    while _need(tm, tn, tk) > budget and tk > 512:
        tk = max(512, (tk // 2) // 128 * 128)
    while _need(tm, tn, tk) > budget and tn > 256:
        tn = max(256, (tn // 2) // 128 * 128)
    while _need(tm, tn, tk) > budget and tm > 2 * sub:
        tm = max(sub, (tm // 2) // sub * sub)

    m_pad = _round_up(M, tm)
    n_pad = _round_up(N, tn)
    k_pad = _round_up(K, tk)
    k_steps = k_pad // tk
    grid_mn = (m_pad // tm, n_pad // tn)

    # ---- pad operands (zero K padding keeps the accumulation exact) ---------
    xp = x2d.astype(mat_dtype)
    if (m_pad, k_pad) != (M, K):
        xp = jnp.pad(xp, ((0, m_pad - M), (0, k_pad - K)))
    wp = w_kn
    if (k_pad, n_pad) != (K, N):
        wp = jnp.pad(wp, ((0, k_pad - K), (0, n_pad - N)))
    bp = b.astype(jnp.float32)
    if n_pad != N:
        bp = jnp.pad(bp, (0, n_pad - N))
    bp = bp.reshape(1, n_pad)

    need = _need(tm, tn, tk)
    vmem_limit = int(min(budget, max(need + (4 << 20), 16 << 20)))

    if k_steps == 1:
        out = pl.pallas_call(
            _linear_bias_kernel_1pass,
            out_shape=jax.ShapeDtypeStruct((m_pad, n_pad), out_dtype),
            grid_spec=pltpu.PrefetchScalarGridSpec(
                num_scalar_prefetch=0,
                grid=grid_mn,
                in_specs=[
                    pl.BlockSpec((tm, k_pad), lambda i, j: (i, 0)),   # x
                    pl.BlockSpec((k_pad, tn), lambda i, j: (0, j)),   # W [K,N]
                    pl.BlockSpec((1, tn), lambda i, j: (0, j)),       # bias
                ],
                out_specs=pl.BlockSpec((tm, tn), lambda i, j: (i, j)),
            ),
            compiler_params=pltpu.CompilerParams(
                dimension_semantics=("parallel", "parallel"),
                vmem_limit_bytes=vmem_limit),
        )(xp, wp, bp)
    else:
        out = pl.pallas_call(
            _linear_bias_kernel_acc,
            out_shape=jax.ShapeDtypeStruct((m_pad, n_pad), out_dtype),
            grid_spec=pltpu.PrefetchScalarGridSpec(
                num_scalar_prefetch=0,
                grid=grid_mn + (k_steps,),
                in_specs=[
                    pl.BlockSpec((tm, tk), lambda i, j, k: (i, k)),   # x
                    pl.BlockSpec((tk, tn), lambda i, j, k: (k, j)),   # W [K,N]
                    pl.BlockSpec((1, tn), lambda i, j, k: (0, j)),    # bias
                ],
                out_specs=pl.BlockSpec((tm, tn), lambda i, j, k: (i, j)),
                scratch_shapes=[pltpu.VMEM((tm, tn), jnp.float32)],
            ),
            compiler_params=pltpu.CompilerParams(
                dimension_semantics=("parallel", "parallel", "arbitrary"),
                vmem_limit_bytes=vmem_limit),
        )(xp, wp, bp)

    if (m_pad, n_pad) != (M, N):
        out = out[:M, :N]
    return out


# ----------------------------------------------------------------------------
# FusedExperts equivalent (JAX wrapper around the kernel)
# ----------------------------------------------------------------------------
class FusedExpertsPallas:
    """JAX/Pallas port of uniperceiver task-MoE FusedExperts (forward only).

    Each expert is an nn.Linear(in_features, out_features).  Top2 routing
    folds two experts' weights/biases into one effective linear layer that is
    executed by the Pallas kernel above.
    """

    def __init__(self, in_features, out_features, num_local_experts, key,
                 use_bias=True, use_bf16_matmul=True):
        self.in_features = in_features
        self.out_features = out_features
        self.num_local_experts = num_local_experts
        self.bias_merge = use_bias
        self.mat_dtype = jnp.bfloat16 if use_bf16_matmul else jnp.float32

        kw, kb = jax.random.split(key)
        # Canonical nn.Linear-layout parameters (kept in f32 for reference).
        self.weights = jax.random.normal(
            kw, (num_local_experts, out_features, in_features),
            dtype=jnp.float32) * 0.02
        if use_bias:
            self.biases = jax.random.normal(
                kb, (num_local_experts, out_features), dtype=jnp.float32) * 0.02
        else:
            self.biases = jnp.zeros((num_local_experts, out_features),
                                    dtype=jnp.float32)
        # Kernel-native bank: pre-transposed to [E, D_in, D_out] and pre-cast
        # to the MXU dtype, so the per-call wrapper only does g1*W1 + g2*W2.
        self.weights_kn = jnp.transpose(self.weights, (0, 2, 1)).astype(
            self.mat_dtype)

    # --- parameter helpers (all on-device; indices/gates may be traced) ------
    @staticmethod
    def _slice_mode(w_kn, b, mode):
        # w_kn: [K, N] (out-features on the last axis), b: [N]
        if mode is None:
            return w_kn, b
        d = w_kn.shape[-1] // 3
        if mode == "q":
            return w_kn[:, :d], b[:d]
        if mode == "kv":
            return w_kn[:, d:], b[d:]
        raise ValueError(mode)

    def _merged_params(self, i1, i2, g1, g2, mode=None):
        # Merge is O(D_in * D_out), done ONCE here (outside the Pallas grid),
        # directly in the MXU dtype; bias merge stays f32.
        w1, b1 = self._slice_mode(jnp.take(self.weights_kn, i1, axis=0),
                                  jnp.take(self.biases, i1, axis=0), mode)
        w2, b2 = self._slice_mode(jnp.take(self.weights_kn, i2, axis=0),
                                  jnp.take(self.biases, i2, axis=0), mode)
        g1m = jnp.asarray(g1, self.mat_dtype)
        g2m = jnp.asarray(g2, self.mat_dtype)
        g1f = jnp.asarray(g1, jnp.float32)
        g2f = jnp.asarray(g2, jnp.float32)
        return w1 * g1m + w2 * g2m, b1 * g1f + b2 * g2f

    def _single_params(self, i, g, mode=None):
        # Dedicated top1 path: one gate-scaled weight, no second-expert traffic.
        w, b = self._slice_mode(jnp.take(self.weights_kn, i, axis=0),
                                jnp.take(self.biases, i, axis=0), mode)
        return w * jnp.asarray(g, self.mat_dtype), b * jnp.asarray(g, jnp.float32)

    def _linear(self, x, w_kn, b):
        """x: [B, S, D_in] -> [B, S, D_out]"""
        B, S, D = x.shape
        y = linear_pallas(x.reshape(B * S, D), w_kn, b)
        return y.reshape(B, S, -1)

    @staticmethod
    def _write_segments(y1, y2):
        """Scatter two sequence segments into one preallocated output
        (avoids the extra HBM read+write of a jnp.concatenate)."""
        B, s1, N = y1.shape
        S = s1 + y2.shape[1]
        out = jnp.zeros((B, S, N), dtype=y1.dtype)
        out = lax.dynamic_update_slice(out, y1, (0, 0, 0))
        out = lax.dynamic_update_slice(out, y2, (0, s1, 0))
        return out

    # --- routing (mirrors the PyTorch module) --------------------------------
    def top1_expert_forward(self, x, indice, gate, mode=None, **kwargs):
        assert mode is None, "unified qkv inference is not supported for top1"
        n_modality = indice.shape[0]
        if n_modality == 1:
            w, b = self._single_params(indice[0], gate[0])
            return self._linear(x, w, b)
        elif n_modality == 2:
            d1 = int(kwargs["sample_info"]["data_cum_length"][1])
            w1, b1 = self._single_params(indice[0], gate[0])
            w2, b2 = self._single_params(indice[1], gate[1])
            y1 = self._linear(x[:, :d1, :], w1, b1)
            y2 = self._linear(x[:, d1:, :], w2, b2)
            return self._write_segments(y1, y2)
        raise NotImplementedError("only support one or two modality")

    def top2_expert_forward(self, x, indices, gates, mode=None, **kwargs):
        # TODO(synk): comm._CAPTION_GEN_MODE single-token fast path not ported.
        n_modality = indices[0].shape[0]
        if n_modality == 1:
            w, b = self._merged_params(indices[0][0], indices[1][0],
                                       gates[0][0], gates[1][0], mode)
            return self._linear(x, w, b)
        elif n_modality == 2:
            d1 = int(kwargs["sample_info"]["data_cum_length"][1])
            if mode == "kv" and kwargs["sample_info"].get("pe_length", 0) > 0:
                d1 += int(kwargs["sample_info"]["pe_length"])
            w1, b1 = self._merged_params(indices[0][0], indices[1][0],
                                         gates[0][0], gates[1][0], mode)
            w2, b2 = self._merged_params(indices[0][1], indices[1][1],
                                         gates[0][1], gates[1][1], mode)
            y1 = self._linear(x[:, :d1, :], w1, b1)
            y2 = self._linear(x[:, d1:, :], w2, b2)
            return self._write_segments(y1, y2)
        raise NotImplementedError("only support one or two modality")

    def forward(self, hidden_states, top_indices=None, gates=None, **kwargs):
        if len(top_indices) == 1:
            out = self.top1_expert_forward(hidden_states, top_indices[0],
                                           gates[0], **kwargs)
        elif len(top_indices) == 2:
            out = self.top2_expert_forward(hidden_states, top_indices, gates,
                                           **kwargs)
        else:
            raise NotImplementedError("only support top1 and top2")
        assert out.shape[1] == hidden_states.shape[1]
        return out


# ----------------------------------------------------------------------------
# Pure-JAX reference (f32, nn.Linear layout) for checking
# ----------------------------------------------------------------------------
def _ref_merged(x, w1, w2, b1, b2, g1, g2):
    w = w1 * g1 + w2 * g2
    b = b1 * g1 + b2 * g2
    return jnp.einsum("bsd,od->bso", x, w) + b


if __name__ == "__main__":
    key = jax.random.PRNGKey(0)
    k_x, k_p, k_q = jax.random.split(key, 3)

    B, S, D = 2, 16, 128          # small shapes; two modalities split at 8
    num_experts = 3
    data1_length = 8
    sample_info = {"data_cum_length": [0, data1_length]}

    x = jax.random.normal(k_x, (B, S, D), dtype=jnp.float32)

    # Tolerances: the reference einsum and the kernel matmul both run at TPU
    # default matmul precision, so comparisons are bounded by bf16-pass error.
    TOL_F32, TOL_BF16 = 1e-2, 5e-2

    # ---- f32-MXU module (tighter check path) --------------------------------
    module = FusedExpertsPallas(in_features=D, out_features=D,
                                num_local_experts=num_experts, key=k_p,
                                use_bf16_matmul=False)

    # top2 routing, two modalities
    top_indices = [jnp.array([0, 1], dtype=jnp.int32),
                   jnp.array([2, 0], dtype=jnp.int32)]
    gates = [jnp.array([0.6, 0.7], dtype=jnp.float32),
             jnp.array([0.4, 0.3], dtype=jnp.float32)]
    out_top2 = jax.block_until_ready(
        module.forward(x, top_indices=top_indices, gates=gates,
                       sample_info=sample_info))
    ref1 = _ref_merged(x[:, :data1_length, :],
                       module.weights[0], module.weights[2],
                       module.biases[0], module.biases[2], 0.6, 0.4)
    ref2 = _ref_merged(x[:, data1_length:, :],
                       module.weights[1], module.weights[0],
                       module.biases[1], module.biases[0], 0.7, 0.3)
    ref_top2 = jnp.concatenate([ref1, ref2], axis=1)
    assert out_top2.shape == (B, S, D)
    assert jnp.allclose(out_top2, ref_top2, atol=TOL_F32, rtol=TOL_F32)

    # top1 routing, single modality
    out_top1 = jax.block_until_ready(
        module.forward(x, top_indices=[jnp.array([1], dtype=jnp.int32)],
                       gates=[jnp.array([0.9], dtype=jnp.float32)],
                       sample_info=sample_info))
    ref_top1 = _ref_merged(x, module.weights[1], module.weights[1],
                           module.biases[1], module.biases[1], 0.9, 0.0)
    assert jnp.allclose(out_top1, ref_top1, atol=TOL_F32, rtol=TOL_F32)

    # top1 routing, two modalities
    out_top1b = jax.block_until_ready(
        module.forward(x, top_indices=[jnp.array([2, 0], dtype=jnp.int32)],
                       gates=[jnp.array([0.8, 0.5], dtype=jnp.float32)],
                       sample_info=sample_info))
    ref_t1b = jnp.concatenate([
        _ref_merged(x[:, :data1_length, :], module.weights[2],
                    module.weights[2], module.biases[2], module.biases[2],
                    0.8, 0.0),
        _ref_merged(x[:, data1_length:, :], module.weights[0],
                    module.weights[0], module.biases[0], module.biases[0],
                    0.5, 0.0)], axis=1)
    assert jnp.allclose(out_top1b, ref_t1b, atol=TOL_F32, rtol=TOL_F32)

    # top2 routing, single modality, qkv weight slicing (mode='q'/'kv')
    module_qkv = FusedExpertsPallas(in_features=D, out_features=3 * D,
                                    num_local_experts=num_experts, key=k_q,
                                    use_bf16_matmul=False)
    ti_q = [jnp.array([0], dtype=jnp.int32), jnp.array([2], dtype=jnp.int32)]
    g_q = [jnp.array([0.55], dtype=jnp.float32),
           jnp.array([0.45], dtype=jnp.float32)]
    out_q = jax.block_until_ready(
        module_qkv.forward(x, top_indices=ti_q, gates=g_q, mode="q",
                           sample_info=sample_info))
    ref_q = _ref_merged(x, module_qkv.weights[0][:D], module_qkv.weights[2][:D],
                        module_qkv.biases[0][:D], module_qkv.biases[2][:D],
                        0.55, 0.45)
    assert out_q.shape == (B, S, D)
    assert jnp.allclose(out_q, ref_q, atol=TOL_F32, rtol=TOL_F32)

    out_kv = jax.block_until_ready(
        module_qkv.forward(x, top_indices=ti_q, gates=g_q, mode="kv",
                           sample_info=sample_info))
    ref_kv = _ref_merged(x, module_qkv.weights[0][D:], module_qkv.weights[2][D:],
                         module_qkv.biases[0][D:], module_qkv.biases[2][D:],
                         0.55, 0.45)
    assert out_kv.shape == (B, S, 2 * D)
    assert jnp.allclose(out_kv, ref_kv, atol=TOL_F32, rtol=TOL_F32)

    # ---- default (bf16-MXU) module, looser tolerance ------------------------
    module_bf16 = FusedExpertsPallas(in_features=D, out_features=D,
                                     num_local_experts=num_experts, key=k_p)
    out_bf16 = jax.block_until_ready(
        module_bf16.forward(x, top_indices=top_indices, gates=gates,
                            sample_info=sample_info))
    assert jnp.allclose(out_bf16, ref_top2, atol=TOL_BF16, rtol=TOL_BF16)

    print("KERNEL_OK")
</pallas_src>

<mosaic_0001>
module attributes {stable_mosaic.version = 11 : i64} {
  func.func @_linear_bias_kernel_1pass(%arg0: i32, %arg1: i32, %arg2: memref<16x128xf32, #tpu.memory_space<vmem>>, %arg3: memref<128x128xf32, #tpu.memory_space<vmem>>, %arg4: memref<1x128xf32, #tpu.memory_space<vmem>>, %arg5: memref<16x128xf32, #tpu.memory_space<vmem>>) attributes {dimension_semantics = [#tpu.dimension_semantics<parallel>, #tpu.dimension_semantics<parallel>], iteration_bounds = array<i64: 1, 1>, scalar_prefetch = 0 : i64, scratch_operands = 0 : i64, tpu.core_type = #tpu.core_type<tc>, window_params = [{transform_indices = @transform_0, window_bounds = array<i64: 16, 128>}, {transform_indices = @transform_1, window_bounds = array<i64: 128, 128>}, {transform_indices = @transform_2, window_bounds = array<i64: 1, 128>}, {transform_indices = @transform_3, window_bounds = array<i64: 16, 128>}]} {
    %c0 = arith.constant 0 : index
    %c0_0 = arith.constant 0 : index
    %0 = vector.load %arg2[%c0, %c0_0] : memref<16x128xf32, #tpu.memory_space<vmem>>, vector<16x128xf32>
    %c0_1 = arith.constant 0 : index
    %c0_2 = arith.constant 0 : index
    %1 = vector.load %arg3[%c0_1, %c0_2] : memref<128x128xf32, #tpu.memory_space<vmem>>, vector<128x128xf32>
    %cst = arith.constant dense<0.000000e+00> : vector<16x128xf32>
    %2 = tpu.matmul %0, %1, %cst {dimension_numbers = #tpu.dot_dimension_numbers<[1], [0], [0], [1], [0, 0, 1, 1], [], []>} : vector<16x128xf32>, vector<128x128xf32>, vector<16x128xf32> -> vector<16x128xf32>
    %c0_3 = arith.constant 0 : index
    %c0_4 = arith.constant 0 : index
    %3 = vector.load %arg4[%c0_3, %c0_4] : memref<1x128xf32, #tpu.memory_space<vmem>>, vector<1x128xf32>
    %4 = vector.broadcast %3 : vector<1x128xf32> to vector<16x128xf32>
    %5 = arith.addf %2, %4 : vector<16x128xf32>
    %c0_5 = arith.constant 0 : index
    %c0_6 = arith.constant 0 : index
    %6 = vector.load %arg5[%c0_5, %c0_6] : memref<16x128xf32, #tpu.memory_space<vmem>>, vector<16x128xf32>
    tpu.vector_store %arg5[%c0_5, %c0_6], %5 {strides = array<i32>} : memref<16x128xf32, #tpu.memory_space<vmem>>, vector<16x128xf32>,
    return
  }
  func.func @transform_0(%arg0: i32, %arg1: i32) -> (i32, i32) {
    %c0_i32 = arith.constant 0 : i32
    %c0_i32_0 = arith.constant 0 : i32
    return %arg0, %c0_i32 : i32, i32
  }
  func.func @transform_1(%arg0: i32, %arg1: i32) -> (i32, i32) {
    %c0_i32 = arith.constant 0 : i32
    %c0_i32_0 = arith.constant 0 : i32
    return %c0_i32, %arg1 : i32, i32
  }
  func.func @transform_2(%arg0: i32, %arg1: i32) -> (i32, i32) {
    %c0_i32 = arith.constant 0 : i32
    %c0_i32_0 = arith.constant 0 : i32
    return %c0_i32, %arg1 : i32, i32
  }
  func.func @transform_3(%arg0: i32, %arg1: i32) -> (i32, i32) {
    %c0_i32 = arith.constant 0 : i32
    return %arg0, %arg1 : i32, i32
  }
}

</mosaic_0001>

<bundles_post_ra>
// kernel: tpu_custom_call.1
= control target key start
LH: loop header
LB: loop body
LE: loop exit
PB: predicated region body
PF: predicated region fallthrough
CT: control target
= control target key end

     0   :  { %8 = vsyncpa [#allocation3], 0  ;;  %s334_s0 = inlined_call_operand.hbm [shape: f32[16,128], index: 0, kind: input, shape index: {}]   ;;  %s335_s1 = inlined_call_operand.hbm [shape: f32[128,128], index: 1, kind: input, shape index: {}]   ;;  %s336_s2 = inlined_call_operand.vmem [shape: f32[1,128], index: 2, kind: input, shape index: {}]   ;;  %s337_s3 = inlined_call_operand.hbm [shape: f32[16,128], index: 3, kind: output, shape index: {}]  }
   0x1   :  { %9 = vsyncpa [#allocation6], 0 }
   0x2   :  { %10 = vsyncpa [#allocation4], 0  ;;  %s288_s12 = smov [#allocation2]  }
   0x3   :  { %s16_s13 = sshll.u32 %s288_s12, 4  ;;  %s17_s13 = int_to_ptr.vmem [resolvable:$true] %s16_s13 }
   0x4   :  { %s230_s14 = scalar_lea.vmem %s17_s13, 256  ;;  %p235_p1 = scmp.lt.s32.totalorder %s17_s13, %s17_s13 }
   0x5   :  { %p231_p0 = scmp.ne.s32.totalorder %s17_s13, %s230_s14  ;;  %p236_p2 = scmp.lt.s32.totalorder %s230_s14, %s230_s14 }
   0x7   :  { %p237_p3 = por %p236_p2, %p235_p1 }
   0x9   :  { %p238_p4 = pnand %p237_p3, %p231_p0 }
   0xb   :  { %241 = shalt.err (!%p238_p4)
}
   0xc   :  { %s289_s15 = smov 128   ;;  %s290_s16 = smov 8  }
   0xd   :  { %22 = dma.hbm_to_vmem [thread:$0]  %s334_s0, 256, %s17_s13, [#allocation3], %s289_s15, %s289_s15, %s290_s16  }
   0xe   :  { %s291_s19 = smov [#allocation5]  }
   0xf   :  { %s28_s20 = sshll.u32 %s291_s19, 4  ;;  %s29_s20 = int_to_ptr.vmem [resolvable:$true] %s28_s20 }
  0x10   :  { %s250_s21 = scalar_lea.vmem %s29_s20, 2048  ;;  %p255_p6 = scmp.lt.s32.totalorder %s29_s20, %s29_s20 }
  0x11   :  { %p251_p5 = scmp.ne.s32.totalorder %s29_s20, %s250_s21  ;;  %p256_p7 = scmp.lt.s32.totalorder %s250_s21, %s250_s21 }
  0x13   :  { %p257_p8 = por %p256_p7, %p255_p6 }
  0x15   :  { %p258_p9 = pnand %p257_p8, %p251_p5 }
  0x17   :  { %261 = shalt.err (!%p258_p9)
}
  0x18   :  { %34 = dma.hbm_to_vmem [thread:$0]  %s335_s1, 2048, %s29_s20, [#allocation6], %s289_s15, %s289_s15, %s290_s16  }
  0x19   :  { %282 = dma.done.wait [#allocation3], 256  }
  0x1a   :  { %283 = vsyncadd [#allocation3], 4294967040 }
  0x1b   :  { %284 = dma.done.wait [#allocation6], 2048  }
  0x1c   :  { %285 = vsyncadd [#allocation6], 4294965248  ;;  %v60_v0 = vld [vmem:[#allocation5 + $0x78] sm:$0xff]  ;;  %v59_v1 = vld [vmem:[#allocation5 + $0x70] sm:$0xff]  ;;  %s292_s24 = smov [#allocation7]  }
  0x1d   :  { %182 = vmatprep.subr.mxu0 %v60_v0  ;;  %v58_v2 = vld [vmem:[#allocation5 + $0x68] sm:$0xff]  ;;  %v57_v3 = vld [vmem:[#allocation5 + $0x60] sm:$0xff]  ;;  %v43_v4 = vld [vmem:[#allocation2] sm:$0xff]  ;;  %s150_s25 = sshll.u32 %s292_s24, 4  ;;  %s151_s25 = int_to_ptr.vmem [resolvable:$true] %s150_s25 }
  0x1e   :  { %183 = vmatpush3.msra.mxu0 %v60_v0  ;;  %v56_v5 = vld [vmem:[#allocation5 + $0x58] sm:$0xff]  ;;  %214 = vmatprep.mubr.f32.mxu0 %v43_v4  ;;  %v55_v6 = vld [vmem:[#allocation5 + $0x50] sm:$0xff]  ;;  %v54_v7 = vld [vmem:[#allocation5 + $0x48] sm:$0xff]  ;;  %s262_s26 = scalar_lea.vmem %s151_s25, 256  ;;  %p267_p11 = scmp.lt.s32.totalorder %s151_s25, %s151_s25 }
  0x1f   :  { %184 = vmatprep.subr.mxu0 %v59_v1  ;;  %v53_v8 = vld [vmem:[#allocation5 + $0x40] sm:$0xff]  ;;  %v52_v9 = vld [vmem:[#allocation5 + $0x38] sm:$0xff]  ;;  %v51_v10 = vld [vmem:[#allocation5 + $0x30] sm:$0xff]  ;;  %p263_p10 = scmp.ne.s32.totalorder %s151_s25, %s262_s26  ;;  %p268_p12 = scmp.lt.s32.totalorder %s262_s26, %s262_s26 }
  0x20   :  { %185 = vmatpush3.msra.mxu0 %v59_v1  ;;  %v50_v11 = vld [vmem:[#allocation5 + $0x28] sm:$0xff]  ;;  %v49_v12 = vld [vmem:[#allocation5 + $0x20] sm:$0xff]  ;;  %v48_v13 = vld [vmem:[#allocation5 + $0x18] sm:$0xff] }
  0x21   :  { %186 = vmatprep.subr.mxu0 %v58_v2  ;;  %v47_v14 = vld [vmem:[#allocation5 + $0x10] sm:$0xff]  ;;  %v46_v15 = vld [vmem:[#allocation5 + $0x8] sm:$0xff]  ;;  %v45_v16 = vld [vmem:[#allocation5] sm:$0xff]  ;;  %p269_p13 = por %p268_p12, %p267_p11 }
  0x22   :  { %187 = vmatpush3.msra.mxu0 %v58_v2  ;;  %v44_v17 = vld [vmem:[#allocation2 + $0x8] sm:$0xff]  ;;  %v163_v18 = vld [vmem:[%s336_s2] ss:$0 sm:$0xff] }
  0x23   :  { %188 = vmatprep.subr.mxu0 %v57_v3  ;;  %p270_p0 = pnand %p269_p13, %p263_p10 }
  0x24   :  { %189 = vmatpush3.msra.mxu0 %v57_v3 }
  0x25   :  { %190 = vmatprep.subr.mxu0 %v56_v5 }
  0x26   :  { %191 = vmatpush3.msra.mxu0 %v56_v5 }
  0x27   :  { %192 = vmatprep.subr.mxu0 %v55_v6 }
  0x28   :  { %193 = vmatpush3.msra.mxu0 %v55_v6 }
  0x29   :  { %194 = vmatprep.subr.mxu0 %v54_v7 }
  0x2a   :  { %195 = vmatpush3.msra.mxu0 %v54_v7 }
  0x2b   :  { %196 = vmatprep.subr.mxu0 %v53_v8 }
  0x2c   :  { %197 = vmatpush3.msra.mxu0 %v53_v8 }
  0x2d   :  { %198 = vmatprep.subr.mxu0 %v52_v9 }
  0x2e   :  { %199 = vmatpush3.msra.mxu0 %v52_v9 }
  0x2f   :  { %200 = vmatprep.subr.mxu0 %v51_v10 }
  0x30   :  { %201 = vmatpush3.msra.mxu0 %v51_v10 }
  0x31   :  { %202 = vmatprep.subr.mxu0 %v50_v11 }
  0x32   :  { %203 = vmatpush3.msra.mxu0 %v50_v11 }
  0x33   :  { %204 = vmatprep.subr.mxu0 %v49_v12 }
  0x34   :  { %205 = vmatpush3.msra.mxu0 %v49_v12 }
  0x35   :  { %206 = vmatprep.subr.mxu0 %v48_v13 }
  0x36   :  { %207 = vmatpush3.msra.mxu0 %v48_v13 }
  0x37   :  { %208 = vmatprep.subr.mxu0 %v47_v14 }
  0x38   :  { %209 = vmatpush3.msra.mxu0 %v47_v14 }
  0x39   :  { %210 = vmatprep.subr.mxu0 %v46_v15 }
  0x3a   :  { %211 = vmatpush3.msra.mxu0 %v46_v15 }
  0x3b   :  { %212 = vmatprep.subr.mxu0 %v45_v16 }
  0x3c   :  { %213 = vmatpush3.msra.mxu0 %v45_v16 }
  0x3d   :  { %215 = vmatmul.mubr.f32.vlgmr.msra.gmra.mxu0 %v44_v17 }
  0xfd   :  { %v216_v19 = vpop.f32.mrf.mxu0 }
  0xfe   :  { %v140_v20 = vadd.f32 %v216_v19, %v163_v18 }
  0xff   :  { %v134_v21 = vpop.f32.mrf.mxu0 }
 0x100   :  { %144 = vst [vmem:[#allocation7 + $0x8] sm:$0xff] %v140_v20  ;;  %v135_v22 = vadd.f32 %v163_v18, %v134_v21 }
 0x102   :  { %143 = vst [vmem:[#allocation7] sm:$0xff] %v135_v22 }
 0x103   :  { %273 = shalt.err (!%p270_p0)
}
 0x104   :  { %156 = dma.vmem_to_hbm [thread:$0]  %s151_s25, 256, %s337_s3, [#allocation4], %s289_s15, %s289_s15, %s290_s16  }
 0x105   :  { %286 = dma.done.wait [#allocation4], 256  }
 0x106   :  { %287 = vsyncadd [#allocation4], 4294967040 }
 0x107   :  { %160 = vsyncpa [#allocation3], 1 }
 0x108   :  { %161 = vsyncpa [#allocation6], 1 }
 0x109   :  { %162 = vsyncpa [#allocation4], 1 }

</bundles_post_ra>
